<compile_context>
chip_gen: v7x
topology: tpu7x:2x2x1
jax: 0.10.0
libtpu: 0.0.40
codegen_flags: <defaults>
</compile_context>

<pallas_src>
import functools

import jax
import jax.numpy as jnp
from jax.experimental import pallas as pl
from jax.experimental.pallas import tpu as pltpu


_LANE = 128
_TARGET_BLOCK_BYTES = 4 * 1024 * 1024   # ~4 MiB / block; x2 buffers x (in+out) ~= 16 MiB resident
_VMEM_LIMIT_BYTES = 32 * 1024 * 1024    # headroom-safe on v5e/v6e/v7x


def _clamp_kernel(x_ref, o_ref, *, min_val, max_val):
    # torch.clamp(x, min, max) == min(max(x, min), max); NaNs propagate.
    # min_val/max_val are static Python scalars -> VPU immediates.
    o_ref[...] = jnp.clip(x_ref[...], min_val, max_val)


def _round_up(x, m):
    return ((x + m - 1) // m) * m


def clamp_pallas(x, min_val, max_val):
    """Elementwise clamp via a Pallas TPU kernel (torch.clamp semantics)."""
    orig_shape = x.shape
    dtype = x.dtype
    itemsize = jnp.dtype(dtype).itemsize
    n = int(x.size)

    min_val = float(min_val)
    max_val = float(max_val)

    if n == 0:
        return jnp.clip(x, min_val, max_val)

    # Sublane packing multiple: 8 rows (f32), 16 (bf16), 32 (int8).
    sublane_mult = max(8, 32 // itemsize)

    # Lane-dense column count: multiple of 128, bounded so tiny inputs do not
    # over-pad, capped at 2048 so block bytes are controlled by the row tile.
    cols = min(2048, max(_LANE, _round_up(pl.cdiv(n, sublane_mult), _LANE)))
    rows = pl.cdiv(n, cols)

    # Row tile sized by bytes, a multiple of the sublane packing.  If it would
    # cover the whole slab, use the full extent (always a legal block shape).
    tr = max(sublane_mult, _TARGET_BLOCK_BYTES // (cols * itemsize))
    tr = _round_up(tr, sublane_mult)
    if tr >= rows:
        tr = rows                       # single-block fast path: grid == (1,)
    grid = (pl.cdiv(rows, tr),)         # partial last block handled by Pallas

    # Host-side pad only if the flat length is not a multiple of cols.
    padded_n = rows * cols
    x_flat = x.reshape(-1)
    if padded_n != n:
        x_flat = jnp.pad(x_flat, (0, padded_n - n))
    x2 = x_flat.reshape(rows, cols)

    kernel = functools.partial(_clamp_kernel, min_val=min_val, max_val=max_val)

    out = pl.pallas_call(
        kernel,
        out_shape=jax.ShapeDtypeStruct((rows, cols), dtype),
        grid_spec=pl.GridSpec(
            grid=grid,
            in_specs=[pl.BlockSpec((tr, cols), lambda i: (i, 0))],
            out_specs=pl.BlockSpec((tr, cols), lambda i: (i, 0)),
        ),
        compiler_params=pltpu.CompilerParams(
            dimension_semantics=("parallel",),   # shards row tiles across v7x's 2 TCs
            vmem_limit_bytes=_VMEM_LIMIT_BYTES,
        ),
        # NOTE: input_output_aliases={0: 0} could be added when the caller no
        # longer needs the input (saves an HBM allocation, not bandwidth).
    )(x2)

    out_flat = out.reshape(-1)
    if padded_n != n:
        out_flat = out_flat[:n]
    return out_flat.reshape(orig_shape)


if __name__ == "__main__":
    key = jax.random.PRNGKey(0)
    clamp_min, clamp_max = -0.5, 0.5

    # 1) Shape consistent with an arbitrary tensor input to torch.clamp.
    x = jax.random.normal(key, (2, 4, 16, 16), dtype=jnp.float32) * 3.0
    y = jax.block_until_ready(clamp_pallas(x, clamp_min, clamp_max))
    y_ref = jnp.clip(x, clamp_min, clamp_max)
    assert y.shape == x.shape and y.dtype == x.dtype
    assert bool(jnp.allclose(y, y_ref)), "mismatch vs reference clamp"

    # 2) Awkward small shape -> exercises the host-padded single-block path.
    x2 = jax.random.normal(jax.random.PRNGKey(1), (3, 257, 33), dtype=jnp.float32) * 2.0
    y2 = jax.block_until_ready(clamp_pallas(x2, clamp_min, clamp_max))
    assert bool(jnp.allclose(y2, jnp.clip(x2, clamp_min, clamp_max))), "mismatch (padded path)"

    # 3) Larger slab -> exercises the multi-block pipelined grid with a
    #    partial last block (rows=1280, tr=512, grid=3), no host padding.
    x3 = jax.random.normal(jax.random.PRNGKey(2), (5, 512, 1024), dtype=jnp.float32) * 2.0
    y3 = jax.block_until_ready(clamp_pallas(x3, clamp_min, clamp_max))
    assert bool(jnp.allclose(y3, jnp.clip(x3, clamp_min, clamp_max))), "mismatch (multi-block path)"

    print("KERNEL_OK")
</pallas_src>

<mosaic_0001>
module attributes {stable_mosaic.version = 11 : i64} {
  func.func @_clamp_kernel(%arg0: i32, %arg1: memref<8x256xf32, #tpu.memory_space<vmem>>, %arg2: memref<8x256xf32, #tpu.memory_space<vmem>>) attributes {dimension_semantics = [#tpu.dimension_semantics<parallel>], iteration_bounds = array<i64: 1>, scalar_prefetch = 0 : i64, scratch_operands = 0 : i64, tpu.core_type = #tpu.core_type<tc>, window_params = [{transform_indices = @transform_0, window_bounds = array<i64: 8, 256>}, {transform_indices = @transform_1, window_bounds = array<i64: 8, 256>}]} {
    %c0 = arith.constant 0 : index
    %c0_0 = arith.constant 0 : index
    %0 = vector.load %arg1[%c0, %c0_0] : memref<8x256xf32, #tpu.memory_space<vmem>>, vector<8x256xf32>
    %cst = arith.constant -5.000000e-01 : f32
    %cst_1 = arith.constant 5.000000e-01 : f32
    %1 = vector.broadcast %cst : f32 to vector<8x256xf32>
    %2 = arith.maximumf %1, %0 : vector<8x256xf32>
    %3 = vector.broadcast %cst_1 : f32 to vector<8x256xf32>
    %4 = arith.minimumf %3, %2 : vector<8x256xf32>
    %c0_2 = arith.constant 0 : index
    %c0_3 = arith.constant 0 : index
    %5 = vector.load %arg2[%c0_2, %c0_3] : memref<8x256xf32, #tpu.memory_space<vmem>>, vector<8x256xf32>
    tpu.vector_store %arg2[%c0_2, %c0_3], %4 {strides = array<i32>} : memref<8x256xf32, #tpu.memory_space<vmem>>, vector<8x256xf32>,
    return
  }
  func.func @transform_0(%arg0: i32) -> (i32, i32) {
    %c0_i32 = arith.constant 0 : i32
    %c0_i32_0 = arith.constant 0 : i32
    return %arg0, %c0_i32 : i32, i32
  }
  func.func @transform_1(%arg0: i32) -> (i32, i32) {
    %c0_i32 = arith.constant 0 : i32
    %c0_i32_0 = arith.constant 0 : i32
    return %arg0, %c0_i32 : i32, i32
  }
}

</mosaic_0001>

<bundles_post_ra>
// kernel: tpu_custom_call.1
= control target key start
LH: loop header
LB: loop body
LE: loop exit
PB: predicated region body
PF: predicated region fallthrough
CT: control target
= control target key end

     0   :  { %6 = vsyncpa [#allocation3], 0  ;;  %s132_s0 = inlined_call_operand.hbm [shape: f32[8,256], index: 0, kind: input, shape index: {}]   ;;  %s133_s1 = inlined_call_operand.hbm [shape: f32[8,256], index: 1, kind: output, shape index: {}]  }
   0x1   :  { %7 = vsyncpa [#allocation4], 0  ;;  %s96_s6 = smov [#allocation2]   ;;  %s48_s10 = scalar_lea.hbm %s132_s0, 256 }
   0x2   :  { %s14_s7 = sshll.u32 %s96_s6, 4  ;;  %p49_p0 = scmp.ne.s32.totalorder %s132_s0, %s48_s10  ;;  %s15_s7 = int_to_ptr.vmem [resolvable:$true] %s14_s7 }
   0x3   :  { %p52_p1 = scmp.lt.u32.totalorder %s48_s10, %s132_s0 }
   0x5   :  { %p54_p2 = pnand %p52_p1, %p49_p0 }
   0x7   :  { %57 = shalt.err (!%p54_p2)
}
   0x8   :  { %s58_s15 = scalar_lea.vmem %s15_s7, 256  ;;  %p63_p4 = scmp.lt.s32.totalorder %s15_s7, %s15_s7 }
   0x9   :  { %p59_p3 = scmp.ne.s32.totalorder %s15_s7, %s58_s15  ;;  %p64_p5 = scmp.lt.s32.totalorder %s58_s15, %s58_s15 }
   0xb   :  { %p65_p6 = por %p64_p5, %p63_p4 }
   0xd   :  { %p66_p7 = pnand %p65_p6, %p59_p3 }
   0xf   :  { %69 = shalt.err (!%p66_p7)
}
  0x10   :  { %17 = dma.hbm_to_vmem [thread:$0]  %s132_s0, 256, %s15_s7, [#allocation3]  }
  0x11   :  { %92 = dma.done.wait [#allocation3], 256  }
  0x12   :  { %93 = vsyncadd [#allocation3], 4294967040  ;;  %s97_s18 = smov [#allocation5]   ;;  %v21_v0 = vld [vmem:[#allocation2] sm:$0xff]  ;;  %v22_v1 = vld [vmem:[#allocation2 + $0x8] sm:$0xff] }
  0x13   :  { %s35_s19 = sshll.u32 %s97_s18, 4  ;;  %v44_v2 = vclamps-f32 %v21_v0, 0.5  ;;  %v45_v3 = vclamps-f32 %v22_v1, 0.5  ;;  %s36_s19 = int_to_ptr.vmem [resolvable:$true] %s35_s19 }
  0x14   :  { %s70_s20 = scalar_lea.vmem %s36_s19, 256  ;;  %p75_p9 = scmp.lt.s32.totalorder %s36_s19, %s36_s19 }
  0x15   :  { %27 = vst [vmem:[#allocation5] sm:$0xff] %v44_v2  ;;  %28 = vst [vmem:[#allocation5 + $0x8] sm:$0xff] %v45_v3  ;;  %p71_p8 = scmp.ne.s32.totalorder %s36_s19, %s70_s20  ;;  %p76_p10 = scmp.lt.s32.totalorder %s70_s20, %s70_s20 }
  0x17   :  { %p77_p11 = por %p76_p10, %p75_p9 }
  0x19   :  { %p78_p12 = pnand %p77_p11, %p71_p8 }
  0x1b   :  { %81 = shalt.err (!%p78_p12)
}
  0x1c   :  { %s82_s22 = scalar_lea.hbm %s133_s1, 256 }
  0x1d   :  { %p83_p13 = scmp.ne.s32.totalorder %s133_s1, %s82_s22  ;;  %p86_p0 = scmp.lt.u32.totalorder %s82_s22, %s133_s1 }
  0x1f   :  { %p88_p1 = pnand %p86_p0, %p83_p13 }
  0x21   :  { %91 = shalt.err (!%p88_p1)
}
  0x22   :  { %38 = dma.vmem_to_hbm [thread:$0]  %s36_s19, 256, %s133_s1, [#allocation4]  }
  0x23   :  { %94 = dma.done.wait [#allocation4], 256  }
  0x24   :  { %95 = vsyncadd [#allocation4], 4294967040 }
  0x25   :  { %42 = vsyncpa [#allocation3], 1 }
  0x26   :  { %43 = vsyncpa [#allocation4], 1 }

</bundles_post_ra>
